<compile_context>
chip_gen: v7x
topology: tpu7x:2x2x1
jax: 0.10.0
libtpu: 0.0.40
codegen_flags: <defaults>
</compile_context>

<pallas_src>
import jax
import jax.numpy as jnp
from jax import lax
from jax.experimental import pallas as pl
from jax.experimental.pallas import tpu as pltpu

COMPUTE_DTYPE = jnp.bfloat16


def _silu(x):
    return x * jax.nn.sigmoid(x)


def _vmem_capacity_bytes():
    """Generation-aware VMEM capacity with a conservative (v7x) fallback."""
    try:
        info = pltpu.get_tpu_info()
        cap = getattr(info, "vmem_capacity_bytes", None)
        if cap:
            return int(cap)
    except Exception:
        pass
    return 64 * 1024 * 1024


def _choose_tile_i(D, I, fixed_bytes, budget_bytes):
    """Largest 128-multiple I-tile whose double-buffered wg/wu/wd fit VMEM."""
    if I <= 256:
        return I, 1
    avail = max(budget_bytes - fixed_bytes, 12 * D * 128)
    ti = avail // (12 * D)          # 2 buffers x (wg + wu + wd) bf16 tiles
    if ti >= I:
        return I, 1
    ti = max(128, (ti // 128) * 128)
    ni = -(-I // ti)
    return int(ti), int(ni)


# ---------------------------------------------------------------------------
# Fused kernel: (re)build per-expert one-hot from indices -> gather (B*KP, D)
# tokens -> I-tiled expert MLP -> f32-gated scatter into the f32 accumulator.
# Shared-expert MLP seeds the accumulator at the very first grid step.
# grid = (E, NI); both axes are reductions into the single output block, so
# expert-weight tiles are fetched exactly once and re-used across the batch.
# ---------------------------------------------------------------------------
def _make_moe_kernel(has_shared):
    def kernel(idx_ref, gate_ref, x_ref, wg_ref, wu_ref, wd_ref, *rest):
        if has_shared:
            swg_ref, swu_ref, swd_ref, out_ref, xin_sc, y_sc, acc_sc = rest
        else:
            out_ref, xin_sc, y_sc, acc_sc = rest

        e = pl.program_id(0)
        i = pl.program_id(1)
        n_e = pl.num_programs(0)
        n_i = pl.num_programs(1)

        B, S, D = x_ref.shape
        KP = idx_ref.shape[2]

        # ---- init: shared-expert MLP becomes the accumulator seed (no serial
        # ---- epilogue tail at pipeline drain). ----
        @pl.when((e == 0) & (i == 0))
        def _init():
            if has_shared:
                for b in range(B):
                    xb = x_ref[b]                                   # (S, D) bf16
                    sg = jnp.dot(xb, swg_ref[...],
                                 preferred_element_type=jnp.float32)
                    su = jnp.dot(xb, swu_ref[...],
                                 preferred_element_type=jnp.float32)
                    sh = (_silu(sg) * su).astype(swd_ref.dtype)
                    acc_sc[b] = jnp.dot(sh, swd_ref[...],
                                        preferred_element_type=jnp.float32)
            else:
                acc_sc[...] = jnp.zeros_like(acc_sc)

        # ---- gather: once per expert (i == 0); one-hot built in VMEM from the
        # ---- int32 indices, all batches folded into the M dimension. ----
        @pl.when(i == 0)
        def _gather():
            for b in range(B):
                ids = idx_ref[0, b]                                 # (KP, 1) i32
                iota = lax.broadcasted_iota(jnp.int32, (KP, S), 1)
                oh = jnp.where(ids == iota, 1.0, 0.0)               # (KP, S) f32
                xin_sc[b * KP:(b + 1) * KP, :] = jnp.dot(
                    oh.astype(x_ref.dtype), x_ref[b],
                    preferred_element_type=jnp.float32).astype(xin_sc.dtype)
            y_sc[...] = jnp.zeros_like(y_sc)

        # ---- expert MLP on the current I tile (M = B*KP rows). ----
        x_in = xin_sc[...]                                          # (B*KP, D) bf16
        g = jnp.dot(x_in, wg_ref[0], preferred_element_type=jnp.float32)
        u = jnp.dot(x_in, wu_ref[0], preferred_element_type=jnp.float32)
        h = (_silu(g) * u).astype(wd_ref.dtype)                     # silu in f32
        y_sc[...] += jnp.dot(h, wd_ref[0], preferred_element_type=jnp.float32)

        # ---- scatter (last I tile): gating applied in f32, accumulate in f32.
        @pl.when(i == n_i - 1)
        def _scatter():
            for b in range(B):
                ids = idx_ref[0, b]                                 # (KP, 1) i32
                gate = gate_ref[0, b]                               # (KP, 1) f32
                iota = lax.broadcasted_iota(jnp.int32, (KP, S), 1)
                oh = jnp.where(ids == iota, 1.0, 0.0)               # (KP, S) f32
                wy = gate * y_sc[b * KP:(b + 1) * KP, :]            # (KP, D) f32
                acc_sc[b] = acc_sc[b] + lax.dot_general(
                    oh, wy, (((0,), (0,)), ((), ())),               # oh^T @ wy
                    preferred_element_type=jnp.float32)

        @pl.when((e == n_e - 1) & (i == n_i - 1))
        def _store():
            out_ref[...] = acc_sc[...].astype(out_ref.dtype)

    return kernel


def _sparse_moe_call(idx, gate, x, wg_t, wu_t, wd_t, shared_w, out_dtype,
                     tile_i, vmem_limit):
    E, B, KP, _ = idx.shape
    _, S, D = x.shape
    I_pad = wg_t.shape[-1]
    NI = I_pad // tile_i
    has_shared = shared_w is not None

    in_specs = [
        pl.BlockSpec((1, B, KP, 1), lambda e, i: (e, 0, 0, 0)),     # token ids
        pl.BlockSpec((1, B, KP, 1), lambda e, i: (e, 0, 0, 0)),     # f32 gates
        pl.BlockSpec((B, S, D), lambda e, i: (0, 0, 0)),            # x (resident)
        pl.BlockSpec((1, D, tile_i), lambda e, i: (e, 0, i)),       # wg^T tile
        pl.BlockSpec((1, D, tile_i), lambda e, i: (e, 0, i)),       # wu^T tile
        pl.BlockSpec((1, tile_i, D), lambda e, i: (e, i, 0)),       # wd^T tile
    ]
    args = [idx, gate, x, wg_t, wu_t, wd_t]
    if has_shared:
        swg_t, swu_t, swd_t = shared_w
        IS = swg_t.shape[-1]
        in_specs += [
            pl.BlockSpec((D, IS), lambda e, i: (0, 0)),             # loaded once
            pl.BlockSpec((D, IS), lambda e, i: (0, 0)),
            pl.BlockSpec((IS, D), lambda e, i: (0, 0)),
        ]
        args += [swg_t, swu_t, swd_t]

    return pl.pallas_call(
        _make_moe_kernel(has_shared),
        out_shape=jax.ShapeDtypeStruct((B, S, D), out_dtype),
        grid=(E, NI),
        in_specs=in_specs,
        out_specs=pl.BlockSpec((B, S, D), lambda e, i: (0, 0, 0)),
        scratch_shapes=[
            pltpu.VMEM((B * KP, D), COMPUTE_DTYPE),   # gathered tokens (all b)
            pltpu.VMEM((B * KP, D), jnp.float32),     # per-expert MLP accum
            pltpu.VMEM((B, S, D), jnp.float32),       # output accumulator
        ],
        compiler_params=pltpu.CompilerParams(
            dimension_semantics=("arbitrary", "arbitrary"),
            vmem_limit_bytes=vmem_limit),
    )(*args)


# ---------------------------------------------------------------------------
# Router (plain JAX / XLA, per perf review) + full forward wrapper.
# ---------------------------------------------------------------------------
def _route(x_bf16, gate_w_bf16, k):
    # logits emitted directly as (B, E, S): softmax over experts is axis=1.
    logits = jnp.einsum('bsd,ed->bes', x_bf16, gate_w_bf16,
                        preferred_element_type=jnp.float32)
    affinity = jax.nn.softmax(logits, axis=1)
    gating, index = jax.lax.top_k(affinity, k)        # over S -> (B, E, k)
    return gating, index


def sparse_moe_block(x, params, *, num_experts, capacity, n_shared_experts):
    B, S, D = x.shape
    E = num_experts
    # Exactly match PyTorch: k = int(S / num_experts * capacity).
    k = int(S / E * capacity)

    cdt = COMPUTE_DTYPE
    xc = x.astype(cdt)

    gating, index = _route(xc, params["gate_weight"].astype(cdt), k)

    # Pad tokens-per-expert for sublane packing (padded slots have gate 0).
    # TODO(synk): round KP up to 256 at production sizes to keep the MXU fed.
    KP = max(8, ((k + 7) // 8) * 8)
    pad_k = KP - k
    if pad_k:
        index = jnp.pad(index, ((0, 0), (0, 0), (0, pad_k)))
        gating = jnp.pad(gating, ((0, 0), (0, 0), (0, pad_k)))
    idx_in = jnp.transpose(index, (1, 0, 2)).astype(jnp.int32)[..., None]
    gate_in = jnp.transpose(gating, (1, 0, 2)).astype(jnp.float32)[..., None]

    # MXU-native (pre-transposed) weight layouts; a real model would store
    # its weights this way and skip these one-time XLA transposes/casts.
    wg_t = jnp.swapaxes(params["wg"], 1, 2).astype(cdt)   # (E, D, I)
    wu_t = jnp.swapaxes(params["wu"], 1, 2).astype(cdt)   # (E, D, I)
    wd_t = jnp.swapaxes(params["wd"], 1, 2).astype(cdt)   # (E, I, D)
    I = wg_t.shape[-1]

    shared_w = None
    IS = 0
    if n_shared_experts > 0:
        shared_w = (jnp.swapaxes(params["s_wg"], 0, 1).astype(cdt),  # (D, Is)
                    jnp.swapaxes(params["s_wu"], 0, 1).astype(cdt),  # (D, Is)
                    jnp.swapaxes(params["s_wd"], 0, 1).astype(cdt))  # (Is, D)
        IS = shared_w[0].shape[-1]

    # Generation-aware VMEM budget / tile size (v7x 64 MiB vs v5e/v6e 128 MiB).
    cap = _vmem_capacity_bytes()
    vmem_limit = min(int(cap * 0.9), 112 * 1024 * 1024)
    out_bytes = x.dtype.itemsize
    fixed = (2 * B * S * D * 2              # x block (double-buffered bf16)
             + 2 * B * S * D * out_bytes    # output block
             + B * S * D * 4                # f32 accumulator scratch
             + B * KP * D * (2 + 4)         # gathered tokens + MLP accumulator
             + 2 * 3 * D * IS * 2           # shared weights (double-buffered)
             + 4 * E * B * KP * 8)          # index / gate blocks (generous)
    tile_i, n_i = _choose_tile_i(D, I, fixed, int(cap * 0.8))

    # Zero-pad I to the tile grid (exact: padded columns/rows contribute 0).
    I_pad = tile_i * n_i
    if I_pad != I:
        wg_t = jnp.pad(wg_t, ((0, 0), (0, 0), (0, I_pad - I)))
        wu_t = jnp.pad(wu_t, ((0, 0), (0, 0), (0, I_pad - I)))
        wd_t = jnp.pad(wd_t, ((0, 0), (0, I_pad - I), (0, 0)))

    return _sparse_moe_call(idx_in, gate_in, xc, wg_t, wu_t, wd_t, shared_w,
                            x.dtype, tile_i, vmem_limit)


# ---------------------------------------------------------------------------
# Pure-JAX reference at the kernel's working precision (bf16 operands,
# f32 accumulation), mirroring PyTorch SparseMoEBlock.forward.
# ---------------------------------------------------------------------------
def reference(x, params, *, num_experts, capacity, n_shared_experts):
    B, S, D = x.shape
    E = num_experts
    cdt = COMPUTE_DTYPE
    xc = x.astype(cdt)
    k = int(S / E * capacity)

    gating, index = _route(xc, params["gate_weight"].astype(cdt), k)
    dispatch = jax.nn.one_hot(index, S, dtype=cdt)                  # (B,E,k,S)
    x_in = jnp.einsum('becs,bsd->becd', dispatch, xc,
                      preferred_element_type=jnp.float32).astype(cdt)

    def mlp(z, wg, wu, wd):
        g = jnp.einsum('...d,id->...i', z, wg.astype(cdt),
                       preferred_element_type=jnp.float32)
        u = jnp.einsum('...d,id->...i', z, wu.astype(cdt),
                       preferred_element_type=jnp.float32)
        h = (_silu(g) * u).astype(cdt)
        return jnp.einsum('...i,di->...d', h, wd.astype(cdt),
                          preferred_element_type=jnp.float32)

    x_e = jnp.stack([mlp(x_in[:, e], params["wg"][e], params["wu"][e],
                         params["wd"][e]) for e in range(E)], axis=1)
    x_out = jnp.einsum('becs,bec,becd->bsd', dispatch.astype(jnp.float32),
                       gating, x_e)
    if n_shared_experts > 0:
        x_out = x_out + mlp(xc, params["s_wg"], params["s_wu"], params["s_wd"])
    return x_out.astype(x.dtype)


if __name__ == "__main__":
    B, S, D = 2, 8, 32
    num_experts = 4
    capacity = 2
    n_shared_experts = 2
    I_expert = 2 * D                      # per-expert MoeMLP intermediate
    I_shared = n_shared_experts * D       # shared MoeMLP intermediate

    key = jax.random.PRNGKey(0)
    ks = jax.random.split(key, 8)
    params = {
        "gate_weight": 0.006 * jax.random.normal(ks[0], (num_experts, D), jnp.float32),
        "wg": 0.1 * jax.random.normal(ks[1], (num_experts, I_expert, D), jnp.float32),
        "wu": 0.1 * jax.random.normal(ks[2], (num_experts, I_expert, D), jnp.float32),
        "wd": 0.1 * jax.random.normal(ks[3], (num_experts, D, I_expert), jnp.float32),
        "s_wg": 0.1 * jax.random.normal(ks[4], (I_shared, D), jnp.float32),
        "s_wu": 0.1 * jax.random.normal(ks[5], (I_shared, D), jnp.float32),
        "s_wd": 0.1 * jax.random.normal(ks[6], (D, I_shared), jnp.float32),
    }
    x = jax.random.normal(ks[7], (B, S, D), jnp.float32)

    out = sparse_moe_block(x, params, num_experts=num_experts,
                           capacity=capacity, n_shared_experts=n_shared_experts)
    out = jax.block_until_ready(out)

    ref = reference(x, params, num_experts=num_experts,
                    capacity=capacity, n_shared_experts=n_shared_experts)
    ref = jax.block_until_ready(ref)

    assert out.shape == (B, S, D)
    err = float(jnp.max(jnp.abs(out - ref)))
    assert jnp.allclose(out, ref, atol=2e-3, rtol=2e-2), err
    print("KERNEL_OK")
</pallas_src>

<mosaic_0001>
module attributes {stable_mosaic.version = 11 : i64} {
  func.func @kernel(%arg0: i32, %arg1: i32, %arg2: memref<1x2x8x1xi32, #tpu.memory_space<vmem>>, %arg3: memref<1x2x8x1xf32, #tpu.memory_space<vmem>>, %arg4: memref<2x8x32xbf16, #tpu.memory_space<vmem>>, %arg5: memref<1x32x64xbf16, #tpu.memory_space<vmem>>, %arg6: memref<1x32x64xbf16, #tpu.memory_space<vmem>>, %arg7: memref<1x64x32xbf16, #tpu.memory_space<vmem>>, %arg8: memref<32x64xbf16, #tpu.memory_space<vmem>>, %arg9: memref<32x64xbf16, #tpu.memory_space<vmem>>, %arg10: memref<64x32xbf16, #tpu.memory_space<vmem>>, %arg11: memref<2x8x32xf32, #tpu.memory_space<vmem>>, %arg12: memref<16x32xbf16, #tpu.memory_space<vmem>>, %arg13: memref<16x32xf32, #tpu.memory_space<vmem>>, %arg14: memref<2x8x32xf32, #tpu.memory_space<vmem>>) attributes {dimension_semantics = [#tpu.dimension_semantics<arbitrary>, #tpu.dimension_semantics<arbitrary>], iteration_bounds = array<i64: 4, 1>, scalar_prefetch = 0 : i64, scratch_operands = 3 : i64, tpu.core_type = #tpu.core_type<tc>, window_params = [{transform_indices = @transform_0, window_bounds = array<i64: 1, 2, 8, 1>}, {transform_indices = @transform_1, window_bounds = array<i64: 1, 2, 8, 1>}, {pipeline_mode = #tpu.pipeline_mode<synchronous>, transform_indices = @transform_2, window_bounds = array<i64: 2, 8, 32>}, {transform_indices = @transform_3, window_bounds = array<i64: 1, 32, 64>}, {transform_indices = @transform_4, window_bounds = array<i64: 1, 32, 64>}, {transform_indices = @transform_5, window_bounds = array<i64: 1, 64, 32>}, {pipeline_mode = #tpu.pipeline_mode<synchronous>, transform_indices = @transform_6, window_bounds = array<i64: 32, 64>}, {pipeline_mode = #tpu.pipeline_mode<synchronous>, transform_indices = @transform_7, window_bounds = array<i64: 32, 64>}, {pipeline_mode = #tpu.pipeline_mode<synchronous>, transform_indices = @transform_8, window_bounds = array<i64: 64, 32>}, {pipeline_mode = #tpu.pipeline_mode<synchronous>, transform_indices = @transform_9, window_bounds = array<i64: 2, 8, 32>}]} {
    %c0_i32 = arith.constant 0 : i32
    %0 = arith.cmpi eq, %arg0, %c0_i32 : i32
    %c0_i32_0 = arith.constant 0 : i32
    %1 = arith.cmpi eq, %arg1, %c0_i32_0 : i32
    %2 = arith.andi %0, %1 : i1
    %3 = arith.extui %2 : i1 to i32
    %c0_i32_1 = arith.constant 0 : i32
    %4 = arith.cmpi ne, %3, %c0_i32_1 : i32
    scf.if %4 {
      %c0_25 = arith.constant 0 : index
      %c0_26 = arith.constant 0 : index
      %c0_27 = arith.constant 0 : index
      %37 = vector.load %arg4[%c0_25, %c0_26, %c0_27] : memref<2x8x32xbf16, #tpu.memory_space<vmem>>, vector<1x8x32xbf16>
      %38 = vector.shape_cast %37 : vector<1x8x32xbf16> to vector<8x32xbf16>
      %c0_28 = arith.constant 0 : index
      %c0_29 = arith.constant 0 : index
      %39 = vector.load %arg8[%c0_28, %c0_29] : memref<32x64xbf16, #tpu.memory_space<vmem>>, vector<32x64xbf16>
      %cst_30 = arith.constant dense<0.000000e+00> : vector<8x64xf32>
      %40 = tpu.matmul %38, %39, %cst_30 {dimension_numbers = #tpu.dot_dimension_numbers<[1], [0], [0], [1], [0, 0, 1, 1], [], []>} : vector<8x32xbf16>, vector<32x64xbf16>, vector<8x64xf32> -> vector<8x64xf32>
      %c0_31 = arith.constant 0 : index
      %c0_32 = arith.constant 0 : index
      %41 = vector.load %arg9[%c0_31, %c0_32] : memref<32x64xbf16, #tpu.memory_space<vmem>>, vector<32x64xbf16>
      %cst_33 = arith.constant dense<0.000000e+00> : vector<8x64xf32>
      %42 = tpu.matmul %38, %41, %cst_33 {dimension_numbers = #tpu.dot_dimension_numbers<[1], [0], [0], [1], [0, 0, 1, 1], [], []>} : vector<8x32xbf16>, vector<32x64xbf16>, vector<8x64xf32> -> vector<8x64xf32>
      %43 = arith.negf %40 : vector<8x64xf32>
      %44 = math.exp %43 : vector<8x64xf32>
      %cst_34 = arith.constant 1.000000e+00 : f32
      %45 = vector.broadcast %cst_34 : f32 to vector<8x64xf32>
      %46 = arith.addf %45, %44 : vector<8x64xf32>
      %47 = arith.divf %45, %46 : vector<8x64xf32>
      %48 = arith.mulf %40, %47 : vector<8x64xf32>
      %49 = arith.mulf %48, %42 : vector<8x64xf32>
      %50 = arith.truncf %49 : vector<8x64xf32> to vector<8x64xbf16>
      %c0_35 = arith.constant 0 : index
      %c0_36 = arith.constant 0 : index
      %51 = vector.load %arg10[%c0_35, %c0_36] : memref<64x32xbf16, #tpu.memory_space<vmem>>, vector<64x32xbf16>
      %cst_37 = arith.constant dense<0.000000e+00> : vector<8x32xf32>
      %52 = tpu.matmul %50, %51, %cst_37 {dimension_numbers = #tpu.dot_dimension_numbers<[1], [0], [0], [1], [0, 0, 1, 1], [], []>} : vector<8x64xbf16>, vector<64x32xbf16>, vector<8x32xf32> -> vector<8x32xf32>
      %c0_38 = arith.constant 0 : index
      %c0_39 = arith.constant 0 : index
      %c0_40 = arith.constant 0 : index
      %53 = vector.load %arg14[%c0_38, %c0_39, %c0_40] : memref<2x8x32xf32, #tpu.memory_space<vmem>>, vector<1x8x32xf32>
      %54 = vector.shape_cast %53 : vector<1x8x32xf32> to vector<8x32xf32>
      %55 = vector.shape_cast %52 : vector<8x32xf32> to vector<1x8x32xf32>
      tpu.vector_store %arg14[%c0_38, %c0_39, %c0_40], %55 {strides = array<i32>} : memref<2x8x32xf32, #tpu.memory_space<vmem>>, vector<1x8x32xf32>,
      %c1 = arith.constant 1 : index
      %c0_41 = arith.constant 0 : index
      %c0_42 = arith.constant 0 : index
      %56 = vector.load %arg4[%c1, %c0_41, %c0_42] : memref<2x8x32xbf16, #tpu.memory_space<vmem>>, vector<1x8x32xbf16>
      %57 = vector.shape_cast %56 : vector<1x8x32xbf16> to vector<8x32xbf16>
      %c0_43 = arith.constant 0 : index
      %c0_44 = arith.constant 0 : index
      %58 = vector.load %arg8[%c0_43, %c0_44] : memref<32x64xbf16, #tpu.memory_space<vmem>>, vector<32x64xbf16>
      %cst_45 = arith.constant dense<0.000000e+00> : vector<8x64xf32>
      %59 = tpu.matmul %57, %58, %cst_45 {dimension_numbers = #tpu.dot_dimension_numbers<[1], [0], [0], [1], [0, 0, 1, 1], [], []>} : vector<8x32xbf16>, vector<32x64xbf16>, vector<8x64xf32> -> vector<8x64xf32>
      %c0_46 = arith.constant 0 : index
      %c0_47 = arith.constant 0 : index
      %60 = vector.load %arg9[%c0_46, %c0_47] : memref<32x64xbf16, #tpu.memory_space<vmem>>, vector<32x64xbf16>
      %cst_48 = arith.constant dense<0.000000e+00> : vector<8x64xf32>
      %61 = tpu.matmul %57, %60, %cst_48 {dimension_numbers = #tpu.dot_dimension_numbers<[1], [0], [0], [1], [0, 0, 1, 1], [], []>} : vector<8x32xbf16>, vector<32x64xbf16>, vector<8x64xf32> -> vector<8x64xf32>
      %62 = arith.negf %59 : vector<8x64xf32>
      %63 = math.exp %62 : vector<8x64xf32>
      %cst_49 = arith.constant 1.000000e+00 : f32
      %64 = vector.broadcast %cst_49 : f32 to vector<8x64xf32>
      %65 = arith.addf %64, %63 : vector<8x64xf32>
      %66 = arith.divf %64, %65 : vector<8x64xf32>
      %67 = arith.mulf %59, %66 : vector<8x64xf32>
      %68 = arith.mulf %67, %61 : vector<8x64xf32>
      %69 = arith.truncf %68 : vector<8x64xf32> to vector<8x64xbf16>
      %c0_50 = arith.constant 0 : index
      %c0_51 = arith.constant 0 : index
      %70 = vector.load %arg10[%c0_50, %c0_51] : memref<64x32xbf16, #tpu.memory_space<vmem>>, vector<64x32xbf16>
      %cst_52 = arith.constant dense<0.000000e+00> : vector<8x32xf32>
      %71 = tpu.matmul %69, %70, %cst_52 {dimension_numbers = #tpu.dot_dimension_numbers<[1], [0], [0], [1], [0, 0, 1, 1], [], []>} : vector<8x64xbf16>, vector<64x32xbf16>, vector<8x32xf32> -> vector<8x32xf32>
      %c1_53 = arith.constant 1 : index
      %c0_54 = arith.constant 0 : index
      %c0_55 = arith.constant 0 : index
      %72 = vector.load %arg14[%c1_53, %c0_54, %c0_55] : memref<2x8x32xf32, #tpu.memory_space<vmem>>, vector<1x8x32xf32>
      %73 = vector.shape_cast %72 : vector<1x8x32xf32> to vector<8x32xf32>
      %74 = vector.shape_cast %71 : vector<8x32xf32> to vector<1x8x32xf32>
      tpu.vector_store %arg14[%c1_53, %c0_54, %c0_55], %74 {strides = array<i32>} : memref<2x8x32xf32, #tpu.memory_space<vmem>>, vector<1x8x32xf32>,
    } else {
    }
    %c0_i32_2 = arith.constant 0 : i32
    %5 = arith.cmpi eq, %arg1, %c0_i32_2 : i32
    %6 = arith.extui %5 : i1 to i32
    %c0_i32_3 = arith.constant 0 : i32
    %7 = arith.cmpi ne, %6, %c0_i32_3 : i32
    scf.if %7 {
      %c0_25 = arith.constant 0 : index
      %c0_26 = arith.constant 0 : index
      %c0_27 = arith.constant 0 : index
      %c0_28 = arith.constant 0 : index
      %37 = vector.load %arg2[%c0_25, %c0_26, %c0_27, %c0_28] : memref<1x2x8x1xi32, #tpu.memory_space<vmem>>, vector<1x1x8x1xi32>
      %38 = vector.shape_cast %37 : vector<1x1x8x1xi32> to vector<8x1xi32>
      %39 = tpu.iota {dimensions = array<i32: 1>} : vector<8x8xi32>
      %40 = vector.broadcast %38 : vector<8x1xi32> to vector<8x8xi32>
      %41 = arith.cmpi eq, %40, %39 : vector<8x8xi32>
      %cst_29 = arith.constant 1.000000e+00 : f32
      %cst_30 = arith.constant 0.000000e+00 : f32
      %42 = vector.broadcast %cst_29 : f32 to vector<8x8xf32>
      %43 = vector.broadcast %cst_30 : f32 to vector<8x8xf32>
      %44 = arith.select %41, %42, %43 : vector<8x8xi1>, vector<8x8xf32>
      %45 = arith.truncf %44 : vector<8x8xf32> to vector<8x8xbf16>
      %c0_31 = arith.constant 0 : index
      %c0_32 = arith.constant 0 : index
      %c0_33 = arith.constant 0 : index
      %46 = vector.load %arg4[%c0_31, %c0_32, %c0_33] : memref<2x8x32xbf16, #tpu.memory_space<vmem>>, vector<1x8x32xbf16>
      %47 = vector.shape_cast %46 : vector<1x8x32xbf16> to vector<8x32xbf16>
      %cst_34 = arith.constant dense<0.000000e+00> : vector<8x32xf32>
      %48 = tpu.matmul %45, %47, %cst_34 {dimension_numbers = #tpu.dot_dimension_numbers<[1], [0], [0], [1], [0, 0, 1, 1], [], []>} : vector<8x8xbf16>, vector<8x32xbf16>, vector<8x32xf32> -> vector<8x32xf32>
      %49 = arith.truncf %48 : vector<8x32xf32> to vector<8x32xbf16>
      %c0_35 = arith.constant 0 : index
      %c0_36 = arith.constant 0 : index
      %50 = vector.load %arg12[%c0_35, %c0_36] : memref<16x32xbf16, #tpu.memory_space<vmem>>, vector<8x32xbf16>
      tpu.vector_store %arg12[%c0_35, %c0_36], %49 {strides = array<i32>} : memref<16x32xbf16, #tpu.memory_space<vmem>>, vector<8x32xbf16>,
      %c0_37 = arith.constant 0 : index
      %c1 = arith.constant 1 : index
      %c0_38 = arith.constant 0 : index
      %c0_39 = arith.constant 0 : index
      %51 = vector.load %arg2[%c0_37, %c1, %c0_38, %c0_39] : memref<1x2x8x1xi32, #tpu.memory_space<vmem>>, vector<1x1x8x1xi32>
      %52 = vector.shape_cast %51 : vector<1x1x8x1xi32> to vector<8x1xi32>
      %53 = tpu.iota {dimensions = array<i32: 1>} : vector<8x8xi32>
      %54 = vector.broadcast %52 : vector<8x1xi32> to vector<8x8xi32>
      %55 = arith.cmpi eq, %54, %53 : vector<8x8xi32>
      %cst_40 = arith.constant 1.000000e+00 : f32
      %cst_41 = arith.constant 0.000000e+00 : f32
      %56 = vector.broadcast %cst_40 : f32 to vector<8x8xf32>
      %57 = vector.broadcast %cst_41 : f32 to vector<8x8xf32>
      %58 = arith.select %55, %56, %57 : vector<8x8xi1>, vector<8x8xf32>
      %59 = arith.truncf %58 : vector<8x8xf32> to vector<8x8xbf16>
      %c1_42 = arith.constant 1 : index
      %c0_43 = arith.constant 0 : index
      %c0_44 = arith.constant 0 : index
      %60 = vector.load %arg4[%c1_42, %c0_43, %c0_44] : memref<2x8x32xbf16, #tpu.memory_space<vmem>>, vector<1x8x32xbf16>
      %61 = vector.shape_cast %60 : vector<1x8x32xbf16> to vector<8x32xbf16>
      %cst_45 = arith.constant dense<0.000000e+00> : vector<8x32xf32>
      %62 = tpu.matmul %59, %61, %cst_45 {dimension_numbers = #tpu.dot_dimension_numbers<[1], [0], [0], [1], [0, 0, 1, 1], [], []>} : vector<8x8xbf16>, vector<8x32xbf16>, vector<8x32xf32> -> vector<8x32xf32>
      %63 = arith.truncf %62 : vector<8x32xf32> to vector<8x32xbf16>
      %c8 = arith.constant 8 : index
      %c0_46 = arith.constant 0 : index
      %64 = vector.load %arg12[%c8, %c0_46] : memref<16x32xbf16, #tpu.memory_space<vmem>>, vector<8x32xbf16>
      tpu.vector_store %arg12[%c8, %c0_46], %63 {strides = array<i32>} : memref<16x32xbf16, #tpu.memory_space<vmem>>, vector<8x32xbf16>,
      %cst_47 = arith.constant 0.000000e+00 : f32
      %65 = vector.broadcast %cst_47 : f32 to vector<16x32xf32>
      %c0_48 = arith.constant 0 : index
      %c0_49 = arith.constant 0 : index
      %66 = vector.load %arg13[%c0_48, %c0_49] : memref<16x32xf32, #tpu.memory_space<vmem>>, vector<16x32xf32>
      tpu.vector_store %arg13[%c0_48, %c0_49], %65 {strides = array<i32>} : memref<16x32xf32, #tpu.memory_space<vmem>>, vector<16x32xf32>,
    } else {
    }
    %c0 = arith.constant 0 : index
    %c0_4 = arith.constant 0 : index
    %8 = vector.load %arg12[%c0, %c0_4] : memref<16x32xbf16, #tpu.memory_space<vmem>>, vector<16x32xbf16>
    %c0_5 = arith.constant 0 : index
    %c0_6 = arith.constant 0 : index
    %c0_7 = arith.constant 0 : index
    %9 = vector.load %arg5[%c0_5, %c0_6, %c0_7] : memref<1x32x64xbf16, #tpu.memory_space<vmem>>, vector<1x32x64xbf16>
    %10 = vector.shape_cast %9 : vector<1x32x64xbf16> to vector<32x64xbf16>
    %cst = arith.constant dense<0.000000e+00> : vector<16x64xf32>
    %11 = tpu.matmul %8, %10, %cst {dimension_numbers = #tpu.dot_dimension_numbers<[1], [0], [0], [1], [0, 0, 1, 1], [], []>} : vector<16x32xbf16>, vector<32x64xbf16>, vector<16x64xf32> -> vector<16x64xf32>
    %c0_8 = arith.constant 0 : index
    %c0_9 = arith.constant 0 : index
    %c0_10 = arith.constant 0 : index
    %12 = vector.load %arg6[%c0_8, %c0_9, %c0_10] : memref<1x32x64xbf16, #tpu.memory_space<vmem>>, vector<1x32x64xbf16>
    %13 = vector.shape_cast %12 : vector<1x32x64xbf16> to vector<32x64xbf16>
    %cst_11 = arith.constant dense<0.000000e+00> : vector<16x64xf32>
    %14 = tpu.matmul %8, %13, %cst_11 {dimension_numbers = #tpu.dot_dimension_numbers<[1], [0], [0], [1], [0, 0, 1, 1], [], []>} : vector<16x32xbf16>, vector<32x64xbf16>, vector<16x64xf32> -> vector<16x64xf32>
    %15 = arith.negf %11 : vector<16x64xf32>
    %16 = math.exp %15 : vector<16x64xf32>
    %cst_12 = arith.constant 1.000000e+00 : f32
    %17 = vector.broadcast %cst_12 : f32 to vector<16x64xf32>
    %18 = arith.addf %17, %16 : vector<16x64xf32>
    %19 = arith.divf %17, %18 : vector<16x64xf32>
    %20 = arith.mulf %11, %19 : vector<16x64xf32>
    %21 = arith.mulf %20, %14 : vector<16x64xf32>
    %22 = arith.truncf %21 : vector<16x64xf32> to vector<16x64xbf16>
    %c0_13 = arith.constant 0 : index
    %c0_14 = arith.constant 0 : index
    %23 = vector.load %arg13[%c0_13, %c0_14] : memref<16x32xf32, #tpu.memory_space<vmem>>, vector<16x32xf32>
    %c0_15 = arith.constant 0 : index
    %c0_16 = arith.constant 0 : index
    %c0_17 = arith.constant 0 : index
    %24 = vector.load %arg7[%c0_15, %c0_16, %c0_17] : memref<1x64x32xbf16, #tpu.memory_space<vmem>>, vector<1x64x32xbf16>
    %25 = vector.shape_cast %24 : vector<1x64x32xbf16> to vector<64x32xbf16>
    %cst_18 = arith.constant dense<0.000000e+00> : vector<16x32xf32>
    %26 = tpu.matmul %22, %25, %cst_18 {dimension_numbers = #tpu.dot_dimension_numbers<[1], [0], [0], [1], [0, 0, 1, 1], [], []>} : vector<16x64xbf16>, vector<64x32xbf16>, vector<16x32xf32> -> vector<16x32xf32>
    %27 = arith.addf %23, %26 : vector<16x32xf32>
    %c0_19 = arith.constant 0 : index
    %c0_20 = arith.constant 0 : index
    %28 = vector.load %arg13[%c0_19, %c0_20] : memref<16x32xf32, #tpu.memory_space<vmem>>, vector<16x32xf32>
    tpu.vector_store %arg13[%c0_19, %c0_20], %27 {strides = array<i32>} : memref<16x32xf32, #tpu.memory_space<vmem>>, vector<16x32xf32>,
    %c0_i32_21 = arith.constant 0 : i32
    %29 = arith.cmpi eq, %arg1, %c0_i32_21 : i32
    %30 = arith.extui %29 : i1 to i32
    %c0_i32_22 = arith.constant 0 : i32
    %31 = arith.cmpi ne, %30, %c0_i32_22 : i32
    scf.if %31 {
      %c0_25 = arith.constant 0 : index
      %c0_26 = arith.constant 0 : index
      %c0_27 = arith.constant 0 : index
      %c0_28 = arith.constant 0 : index
      %37 = vector.load %arg2[%c0_25, %c0_26, %c0_27, %c0_28] : memref<1x2x8x1xi32, #tpu.memory_space<vmem>>, vector<1x1x8x1xi32>
      %38 = vector.shape_cast %37 : vector<1x1x8x1xi32> to vector<8x1xi32>
      %c0_29 = arith.constant 0 : index
      %c0_30 = arith.constant 0 : index
      %c0_31 = arith.constant 0 : index
      %c0_32 = arith.constant 0 : index
      %39 = vector.load %arg3[%c0_29, %c0_30, %c0_31, %c0_32] : memref<1x2x8x1xf32, #tpu.memory_space<vmem>>, vector<1x1x8x1xf32>
      %40 = vector.shape_cast %39 : vector<1x1x8x1xf32> to vector<8x1xf32>
      %41 = tpu.iota {dimensions = array<i32: 1>} : vector<8x8xi32>
      %42 = vector.broadcast %38 : vector<8x1xi32> to vector<8x8xi32>
      %43 = arith.cmpi eq, %42, %41 : vector<8x8xi32>
      %cst_33 = arith.constant 1.000000e+00 : f32
      %cst_34 = arith.constant 0.000000e+00 : f32
      %44 = vector.broadcast %cst_33 : f32 to vector<8x8xf32>
      %45 = vector.broadcast %cst_34 : f32 to vector<8x8xf32>
      %46 = arith.select %43, %44, %45 : vector<8x8xi1>, vector<8x8xf32>
      %c0_35 = arith.constant 0 : index
      %c0_36 = arith.constant 0 : index
      %47 = vector.load %arg13[%c0_35, %c0_36] : memref<16x32xf32, #tpu.memory_space<vmem>>, vector<8x32xf32>
      %48 = vector.broadcast %40 : vector<8x1xf32> to vector<8x32xf32>
      %49 = arith.mulf %48, %47 : vector<8x32xf32>
      %c0_37 = arith.constant 0 : index
      %c0_38 = arith.constant 0 : index
      %c0_39 = arith.constant 0 : index
      %50 = vector.load %arg14[%c0_37, %c0_38, %c0_39] : memref<2x8x32xf32, #tpu.memory_space<vmem>>, vector<1x8x32xf32>
      %51 = vector.shape_cast %50 : vector<1x8x32xf32> to vector<8x32xf32>
      %cst_40 = arith.constant dense<0.000000e+00> : vector<8x32xf32>
      %52 = tpu.matmul %46, %49, %cst_40 {dimension_numbers = #tpu.dot_dimension_numbers<[0], [0], [1], [1], [0, 1, 1, 1], [], []>} : vector<8x8xf32>, vector<8x32xf32>, vector<8x32xf32> -> vector<8x32xf32>
      %53 = arith.addf %51, %52 : vector<8x32xf32>
      %c0_41 = arith.constant 0 : index
      %c0_42 = arith.constant 0 : index
      %c0_43 = arith.constant 0 : index
      %54 = vector.load %arg14[%c0_41, %c0_42, %c0_43] : memref<2x8x32xf32, #tpu.memory_space<vmem>>, vector<1x8x32xf32>
      %55 = vector.shape_cast %54 : vector<1x8x32xf32> to vector<8x32xf32>
      %56 = vector.shape_cast %53 : vector<8x32xf32> to vector<1x8x32xf32>
      tpu.vector_store %arg14[%c0_41, %c0_42, %c0_43], %56 {strides = array<i32>} : memref<2x8x32xf32, #tpu.memory_space<vmem>>, vector<1x8x32xf32>,
      %c0_44 = arith.constant 0 : index
      %c1 = arith.constant 1 : index
      %c0_45 = arith.constant 0 : index
      %c0_46 = arith.constant 0 : index
      %57 = vector.load %arg2[%c0_44, %c1, %c0_45, %c0_46] : memref<1x2x8x1xi32, #tpu.memory_space<vmem>>, vector<1x1x8x1xi32>
      %58 = vector.shape_cast %57 : vector<1x1x8x1xi32> to vector<8x1xi32>
      %c0_47 = arith.constant 0 : index
      %c1_48 = arith.constant 1 : index
      %c0_49 = arith.constant 0 : index
      %c0_50 = arith.constant 0 : index
      %59 = vector.load %arg3[%c0_47, %c1_48, %c0_49, %c0_50] : memref<1x2x8x1xf32, #tpu.memory_space<vmem>>, vector<1x1x8x1xf32>
      %60 = vector.shape_cast %59 : vector<1x1x8x1xf32> to vector<8x1xf32>
      %61 = tpu.iota {dimensions = array<i32: 1>} : vector<8x8xi32>
      %62 = vector.broadcast %58 : vector<8x1xi32> to vector<8x8xi32>
      %63 = arith.cmpi eq, %62, %61 : vector<8x8xi32>
      %cst_51 = arith.constant 1.000000e+00 : f32
      %cst_52 = arith.constant 0.000000e+00 : f32
      %64 = vector.broadcast %cst_51 : f32 to vector<8x8xf32>
      %65 = vector.broadcast %cst_52 : f32 to vector<8x8xf32>
      %66 = arith.select %63, %64, %65 : vector<8x8xi1>, vector<8x8xf32>
      %c8 = arith.constant 8 : index
      %c0_53 = arith.constant 0 : index
      %67 = vector.load %arg13[%c8, %c0_53] : memref<16x32xf32, #tpu.memory_space<vmem>>, vector<8x32xf32>
      %68 = vector.broadcast %60 : vector<8x1xf32> to vector<8x32xf32>
      %69 = arith.mulf %68, %67 : vector<8x32xf32>
      %c1_54 = arith.constant 1 : index
      %c0_55 = arith.constant 0 : index
      %c0_56 = arith.constant 0 : index
      %70 = vector.load %arg14[%c1_54, %c0_55, %c0_56] : memref<2x8x32xf32, #tpu.memory_space<vmem>>, vector<1x8x32xf32>
      %71 = vector.shape_cast %70 : vector<1x8x32xf32> to vector<8x32xf32>
      %cst_57 = arith.constant dense<0.000000e+00> : vector<8x32xf32>
      %72 = tpu.matmul %66, %69, %cst_57 {dimension_numbers = #tpu.dot_dimension_numbers<[0], [0], [1], [1], [0, 1, 1, 1], [], []>} : vector<8x8xf32>, vector<8x32xf32>, vector<8x32xf32> -> vector<8x32xf32>
      %73 = arith.addf %71, %72 : vector<8x32xf32>
      %c1_58 = arith.constant 1 : index
      %c0_59 = arith.constant 0 : index
      %c0_60 = arith.constant 0 : index
      %74 = vector.load %arg14[%c1_58, %c0_59, %c0_60] : memref<2x8x32xf32, #tpu.memory_space<vmem>>, vector<1x8x32xf32>
      %75 = vector.shape_cast %74 : vector<1x8x32xf32> to vector<8x32xf32>
      %76 = vector.shape_cast %73 : vector<8x32xf32> to vector<1x8x32xf32>
      tpu.vector_store %arg14[%c1_58, %c0_59, %c0_60], %76 {strides = array<i32>} : memref<2x8x32xf32, #tpu.memory_space<vmem>>, vector<1x8x32xf32>,
    } else {
    }
    %c3_i32 = arith.constant 3 : i32
    %32 = arith.cmpi eq, %arg0, %c3_i32 : i32
    %c0_i32_23 = arith.constant 0 : i32
    %33 = arith.cmpi eq, %arg1, %c0_i32_23 : i32
    %34 = arith.andi %32, %33 : i1
    %35 = arith.extui %34 : i1 to i32
    %c0_i32_24 = arith.constant 0 : i32
    %36 = arith.cmpi ne, %35, %c0_i32_24 : i32
    scf.if %36 {
      %c0_25 = arith.constant 0 : index
      %c0_26 = arith.constant 0 : index
      %c0_27 = arith.constant 0 : index
      %37 = vector.load %arg14[%c0_25, %c0_26, %c0_27] : memref<2x8x32xf32, #tpu.memory_space<vmem>>, vector<2x8x32xf32>
      %c0_28 = arith.constant 0 : index
      %c0_29 = arith.constant 0 : index
      %c0_30 = arith.constant 0 : index
      %38 = vector.load %arg11[%c0_28, %c0_29, %c0_30] : memref<2x8x32xf32, #tpu.memory_space<vmem>>, vector<2x8x32xf32>
      tpu.vector_store %arg11[%c0_28, %c0_29, %c0_30], %37 {strides = array<i32>} : memref<2x8x32xf32, #tpu.memory_space<vmem>>, vector<2x8x32xf32>,
    } else {
    }
    return
  }
  func.func @transform_0(%arg0: i32, %arg1: i32) -> (i32, i32, i32, i32) {
    %c0_i32 = arith.constant 0 : i32
    %c0_i32_0 = arith.constant 0 : i32
    %c0_i32_1 = arith.constant 0 : i32
    %c0_i32_2 = arith.constant 0 : i32
    return %arg0, %c0_i32, %c0_i32_0, %c0_i32_1 : i32, i32, i32, i32
  }
  func.func @transform_1(%arg0: i32, %arg1: i32) -> (i32, i32, i32, i32) {
    %c0_i32 = arith.constant 0 : i32
    %c0_i32_0 = arith.constant 0 : i32
    %c0_i32_1 = arith.constant 0 : i32
    %c0_i32_2 = arith.constant 0 : i32
    return %arg0, %c0_i32, %c0_i32_0, %c0_i32_1 : i32, i32, i32, i32
  }
  func.func @transform_2(%arg0: i32, %arg1: i32) -> (i32, i32, i32) {
    %c0_i32 = arith.constant 0 : i32
    %c0_i32_0 = arith.constant 0 : i32
    %c0_i32_1 = arith.constant 0 : i32
    %c0_i32_2 = arith.constant 0 : i32
    return %c0_i32, %c0_i32_0, %c0_i32_1 : i32, i32, i32
  }
  func.func @transform_3(%arg0: i32, %arg1: i32) -> (i32, i32, i32) {
    %c0_i32 = arith.constant 0 : i32
    %c0_i32_0 = arith.constant 0 : i32
    return %arg0, %c0_i32, %arg1 : i32, i32, i32
  }
  func.func @transform_4(%arg0: i32, %arg1: i32) -> (i32, i32, i32) {
    %c0_i32 = arith.constant 0 : i32
    %c0_i32_0 = arith.constant 0 : i32
    return %arg0, %c0_i32, %arg1 : i32, i32, i32
  }
  func.func @transform_5(%arg0: i32, %arg1: i32) -> (i32, i32, i32) {
    %c0_i32 = arith.constant 0 : i32
    %c0_i32_0 = arith.constant 0 : i32
    return %arg0, %arg1, %c0_i32 : i32, i32, i32
  }
  func.func @transform_6(%arg0: i32, %arg1: i32) -> (i32, i32) {
    %c0_i32 = arith.constant 0 : i32
    %c0_i32_0 = arith.constant 0 : i32
    %c0_i32_1 = arith.constant 0 : i32
    return %c0_i32, %c0_i32_0 : i32, i32
  }
  func.func @transform_7(%arg0: i32, %arg1: i32) -> (i32, i32) {
    %c0_i32 = arith.constant 0 : i32
    %c0_i32_0 = arith.constant 0 : i32
    %c0_i32_1 = arith.constant 0 : i32
    return %c0_i32, %c0_i32_0 : i32, i32
  }
  func.func @transform_8(%arg0: i32, %arg1: i32) -> (i32, i32) {
    %c0_i32 = arith.constant 0 : i32
    %c0_i32_0 = arith.constant 0 : i32
    %c0_i32_1 = arith.constant 0 : i32
    return %c0_i32, %c0_i32_0 : i32, i32
  }
  func.func @transform_9(%arg0: i32, %arg1: i32) -> (i32, i32, i32) {
    %c0_i32 = arith.constant 0 : i32
    %c0_i32_0 = arith.constant 0 : i32
    %c0_i32_1 = arith.constant 0 : i32
    %c0_i32_2 = arith.constant 0 : i32
    return %c0_i32, %c0_i32_0, %c0_i32_1 : i32, i32, i32
  }
}

</mosaic_0001>

<bundles_post_ra>
// kernel: tpu_custom_call.1
= control target key start
LH: loop header
LB: loop body
LE: loop exit
PB: predicated region body
PF: predicated region fallthrough
CT: control target
= control target key end

     0   :  { %14 = vsyncpa [#allocation6], 0  ;;  %s2007_s30 = smov 0   ;;  %s2009_s10 = smov 0   ;;  %s2256_s0 = inlined_call_operand.vmem [shape: s32[4,2,8,1], index: 0, kind: input, shape index: {}]   ;;  %s2257_s1 = inlined_call_operand.vmem [shape: f32[4,2,8,1], index: 1, kind: input, shape index: {}]   ;;  %s2258_s2 = inlined_call_operand.vmem [shape: bf16[2,8,32], index: 2, kind: input, shape index: {}]   ;;  %s2259_s3 = inlined_call_operand.vmem [shape: bf16[4,32,64], index: 3, kind: input, shape index: {}]   ;;  %s2260_s4 = inlined_call_operand.vmem [shape: bf16[4,32,64], index: 4, kind: input, shape index: {}]   ;;  %s2261_s5 = inlined_call_operand.vmem [shape: bf16[4,64,32], index: 5, kind: input, shape index: {}]   ;;  %s2262_s6 = inlined_call_operand.vmem [shape: bf16[32,64], index: 6, kind: input, shape index: {}]   ;;  %s2263_s7 = inlined_call_operand.vmem [shape: bf16[32,64], index: 7, kind: input, shape index: {}]   ;;  %s2264_s8 = inlined_call_operand.vmem [shape: bf16[64,32], index: 8, kind: input, shape index: {}]   ;;  %s2265_s9 = inlined_call_operand.hbm [shape: f32[2,8,32], index: 9, kind: output, shape index: {}]  }
   0x1   :  { %s2011_s11 = smov 0  }
   0x2 LB: > { %s1595_s12 = sadd.s32 4294967295, %s1947_s11   ;;  %s32_s13 = sadd.s32 1, %s1943_s10  ;;  %s1947_s11 = sphi %s2011_s11, %s20_s11   ;;  %s1943_s10 = sphi %s2009_s10, %s2268_s10   ;;  %s1939_s30 = sphi %s2007_s30, %s2267_s30  }
   0x3   : > { %p34_p0 = scmp.ge.s32.totalorder %s32_s13, 4  ;;  %p1598_p1 = scmp.ge.s32.totalorder %s1947_s11, 1 }
   0x4   : > { %p352_p2 = scmp.lt.s32.totalorder %s1947_s11, 5 }
   0x5   : > { %s2270_s13 = smov (%p34_p0, %s32_s13), 0 }
   0x6   : > { %p353_p3 = pnand %p1598_p1, %p352_p2 }
   0x7   : > { %p413_p4 = scmp.lt.s32.totalorder (!%p353_p3), %s1939_s30, 3  ;;  %p450_p5 = scmp.eq.s32.totalorder (!%p353_p3), %s1939_s30, 0 }
   0x8   : > { %356 = sbr.rel (%p353_p3) target bundleno = 1584 (0x630), region = 56 }
   0xf   : > { %s414_s14 = scalar_select %p413_p4, %s1939_s30, 3 }
  0x10   : > { %455 = sbr.rel (!%p450_p5) target bundleno = 500 (0x1f4), region = 60  ;;  %v1853_v0 = vld [vmem:[%s2262_s6] sm:$0xff] (%p450_p5)   ;;  %v1949_v1 = vmov (%p450_p5), 0.0   ;;  %v1854_v2 = vld [vmem:[%s2262_s6 + $0x8] sm:$0xff] (%p450_p5)   ;;  %vm1950_vm0 = vmmov (%p450_p5), 0   ;;  %vm473_vm1 = vcmask (%p450_p5), 261120  }
  0x11   : > { %s1661_s15 = sshll.u32 %s414_s14, 4  ;;  %s1665_s16 = sshll.u32 %s414_s14, 5  ;;  %1709 = vmatprep.subr.bf16.mxu1 (%p450_p5), %v1949_v1  ;;  %1725 = vmatprep.subr.bf16.mxu0 (%p450_p5), %v1949_v1  ;;  %v456_v3 = vld [vmem:[%s2258_s2] sm:$0xf] (%p450_p5)  ;;  %v1856_v5 = vld [vmem:[%s2263_s7 + $0x8] sm:$0xff] (%p450_p5)   ;;  %v1863_v13 = vld [vmem:[%s2264_s8 + $0x10] sm:$0xff] (%p450_p5)  }
  0x12   : > { %s2034_s19 = scalar_lea.vmem %s2256_s0, %s1661_s15  ;;  %s2039_s22 = scalar_lea.vmem %s2257_s1, %s1661_s15  ;;  %1710 = vmatpush3.bf16.msra.mxu1 (%p450_p5), %v1853_v0  ;;  %1713 = vmatprep.mubr.msk.bf16.mxu1 (%p450_p5), %vm1950_vm0, %v1949_v1  ;;  %v1855_v4 = vld [vmem:[%s2263_s7] sm:$0xff] (%p450_p5)   ;;  %v1858_v7 = vld [vmem:[%s2262_s6 + $0x8] sm:$0xff] (%p450_p5)   ;;  %v1864_v14 = vld [vmem:[%s2264_s8 + $0x18] sm:$0xff] (%p450_p5)   ;;  %vm614_vm2 = vcmask (%p450_p5), 523264  }
  0x13   : > { %s2044_s25 = scalar_lea.vmem %s2259_s3, %s1661_s15  ;;  %s2049_s28 = scalar_lea.vmem %s2260_s4, %s1661_s15  ;;  %1711 = vmatprep.subr.bf16.mxu1 (%p450_p5), %v1949_v1  ;;  %1733 = vmatprep.mubr.msk.bf16.mxu0 (%p450_p5), %vm1950_vm0, %v1949_v1  ;;  %v1857_v6 = vld [vmem:[%s2262_s6] sm:$0xff] (%p450_p5)   ;;  %v1860_v10 = vld [vmem:[%s2263_s7 + $0x8] sm:$0xff] (%p450_p5)   ;;  %v1867_v43 = vld [vmem:[%s2264_s8 + $0x10] sm:$0xff] (%p450_p5)  }
  0x14   : > { %s2054_s17 = scalar_lea.vmem %s2261_s5, %s1665_s16  ;;  %v1622_v8 = vld [vmem:[%s2258_s2 + $0x4] sm:$0xf] (%p450_p5)  ;;  %v1862_v12 = vld [vmem:[%s2264_s8 + $0x8] sm:$0xff] (%p450_p5)   ;;  %v1868_v45 = vld [vmem:[%s2264_s8 + $0x18] sm:$0xff] (%p450_p5)  }
  0x15   : > { %v1859_v9 = vld [vmem:[%s2263_s7] sm:$0xff] (%p450_p5)   ;;  %v1866_v42 = vld [vmem:[%s2264_s8 + $0x8] sm:$0xff] (%p450_p5)  }
  0x16   : > { %1712 = vmatpush3.bf16.msra.mxu1 (%p450_p5), %v1854_v2  ;;  %v1861_v11 = vld [vmem:[%s2264_s8] sm:$0xff] (%p450_p5)  }
  0x17   : > { %1717 = vmatprep.subr.bf16.mxu1 %v1949_v1  ;;  %1726 = vmatpush3.bf16.msra.mxu0 %v1861_v11  ;;  %v1865_v40 = vld [vmem:[%s2264_s8] sm:$0xff]  }
  0x18   : > { %1727 = vmatprep.subr.bf16.mxu0 %v1949_v1 }
  0x19   : > { %1714 = vmatmul.mubr.msk.bf16.vlgmr.msra.gmra.mrb[0].mxu1 %vm473_vm1, %v456_v3 }
  0x1a   : > { %1718 = vmatpush3.bf16.msra.mxu1 %v1855_v4  ;;  %1721 = vmatprep.mubr.msk.bf16.mxu1 %vm1950_vm0, %v1949_v1 }
  0x1b   : > { %1719 = vmatprep.subr.bf16.mxu1 %v1949_v1  ;;  %1728 = vmatpush3.bf16.msra.mxu0 %v1862_v12 }
  0x1c   : > { %1729 = vmatprep.subr.bf16.mxu0 %v1949_v1 }
  0x1e   : > { %1720 = vmatpush3.bf16.msra.mxu1 %v1856_v5 }
  0x1f   : > { %1737 = vmatprep.subr.bf16.mxu1 %v1949_v1  ;;  %1730 = vmatpush3.bf16.msra.mxu0 %v1863_v13 }
  0x20   : > { %1731 = vmatprep.subr.bf16.mxu0 %v1949_v1 }
  0x21   : > { %1722 = vmatmul.mubr.msk.bf16.vlgmr.msra.gmra.mrb[4].mxu1 %vm473_vm1, %v456_v3 }
  0x22   : > { %1738 = vmatpush3.bf16.msra.mxu1 %v1857_v6  ;;  %1741 = vmatprep.mubr.msk.bf16.mxu1 %vm1950_vm0, %v1949_v1 }
  0x23   : > { %1739 = vmatprep.subr.bf16.mxu1 %v1949_v1  ;;  %1732 = vmatpush3.bf16.msra.mxu0 %v1864_v14 }
  0x24   : > { %1753 = vmatprep.subr.bf16.mxu0 %v1949_v1 }
  0x26   : > { %1740 = vmatpush3.bf16.msra.mxu1 %v1858_v7 }
  0x27   : > { %1745 = vmatprep.subr.bf16.mxu1 %v1949_v1 }
  0x29   : > { %1742 = vmatmul.mubr.msk.bf16.vlgmr.msra.gmra.mrb[8].mxu1 %vm473_vm1, %v1622_v8 }
  0x2a   : > { %1746 = vmatpush3.bf16.msra.mxu1 %v1859_v9  ;;  %1749 = vmatprep.mubr.msk.bf16.mxu1 %vm1950_vm0, %v1949_v1 }
  0x2b   : > { %1747 = vmatprep.subr.bf16.mxu1 %v1949_v1 }
  0x2e   : > { %1748 = vmatpush3.bf16.msra.mxu1 %v1860_v10 }
  0x31   : > { %1750 = vmatmul.mubr.msk.bf16.vlgmr.msra.gmra.mrb[12].mxu1 %vm473_vm1, %v1622_v8 }
  0xec   : > { %v511_v15 = vpop.f32.mrb[0].mxu1 }
  0xed   : > { %v1616_v16 = vmul.f32 -1.442695, %v511_v15  ;;  %v1715_v17 = vpop.f32.mrb[1].mxu1 }
  0xee   : > { %v514_v18 = vpop.f32.mrb[2].mxu1 }
  0xef   : > { %1869 = vpow2.f32 %v1616_v16  ;;  %v1716_v19 = vpop.f32.mrb[3].mxu1 }
  0xf4   : > { %v567_v20 = vpop.f32.mrb[4].mxu1 }
  0xf5   : > { %v1723_v21 = vpop.f32.mrb[5].mxu1 }
  0xf6   : > { %v570_v22 = vpop.f32.mrb[6].mxu1 }
  0xf7   : > { %v1724_v23 = vpop.f32.mrb[7].mxu1 }
  0xf9   : > { %v1870_v24 = vpop.eup %1869 }
  0xfa   : > { %v576_v25 = vadd.f32 1.0, %v1870_v24 }
  0xfc   : > { %1871 = vrcp.f32 %v576_v25  ;;  %v714_v26 = vpop.f32.mrb[8].mxu1 }
  0xfd   : > { %v1629_v27 = vmul.f32 -1.442695, %v714_v26  ;;  %v1743_v28 = vpop.f32.mrb[9].mxu1 }
  0xfe   : > { %v717_v29 = vpop.f32.mrb[10].mxu1 }
  0xff   : > { %1873 = vpow2.f32 %v1629_v27  ;;  %v1744_v30 = vpop.f32.mrb[11].mxu1 }
 0x104   : > { %v770_v31 = vpop.f32.mrb[12].mxu1 }
 0x105   : > { %v1751_v32 = vpop.f32.mrb[13].mxu1 }
 0x106   : > { %v1872_v33 = vpop.eup %1871  ;;  %v773_v34 = vpop.f32.mrb[14].mxu1 }
 0x107   : > { %v579_v35 = vmul.f32 %v1872_v33, %v511_v15  ;;  %v1752_v36 = vpop.f32.mrb[15].mxu1 }
 0x109   : > { %v1874_v37 = vpop.eup %1873  ;;  %v580_v38 = vmul.f32 %v579_v35, %v567_v20 }
 0x10a   : > { %v779_v39 = vadd.f32 1.0, %v1874_v37 }
 0x10b   : > { %v581_v41 = vpack.c.bf16 %v580_v38, %v580_v38 }
 0x10c   : > { %1875 = vrcp.f32 %v779_v39 }
 0x10d   : > { %1734 = vmatmul.mubr.msk.bf16.vlgmr.msra.gmra.mrb[0].mxu0 %vm614_vm2, %v581_v41 }
 0x10e   : > { %1754 = vmatpush3.bf16.msra.mxu0 %v1865_v40  ;;  %1761 = vmatprep.mubr.msk.bf16.mxu0 %vm1950_vm0, %v1949_v1 }
 0x10f   : > { %1755 = vmatprep.subr.bf16.mxu0 %v1949_v1 }
 0x112   : > { %1756 = vmatpush3.bf16.msra.mxu0 %v1866_v42 }
 0x113   : > { %1757 = vmatprep.subr.bf16.mxu0 %v1949_v1 }
 0x116   : > { %v1876_v44 = vpop.eup %1875  ;;  %1758 = vmatpush3.bf16.msra.mxu0 %v1867_v43 }
 0x117   : > { %v782_v46 = vmul.f32 %v1876_v44, %v714_v26  ;;  %1759 = vmatprep.subr.bf16.mxu0 %v1949_v1 }
 0x119   : > { %v783_v47 = vmul.f32 %v782_v46, %v770_v31 }
 0x11a   : > { %1760 = vmatpush3.bf16.msra.mxu0 %v1868_v45 }
 0x11b   : > { %v784_v48 = vpack.c.bf16 %v783_v47, %v783_v47 }
 0x11d   : > { %1762 = vmatmul.mubr.msk.bf16.vlgmr.msra.gmra.mrb[4].mxu0 %vm614_vm2, %v784_v48 }
 0x1e0   : > { %v652_v49 = vpop.f32.mrb[0].mxu0 }
 0x1e1   : > { %658 = vst.msk [vmem:[#allocation4] sm:$0xff] %vm473_vm1, %v652_v49  ;;  %v1735_v50 = vpop.f32.mrb[1].mxu0 }
 0x1e2   : > { %v655_v51 = vpop.f32.mrb[2].mxu0 }
 0x1e3   : > { %v1736_v52 = vpop.f32.mrb[3].mxu0 }
 0x1f0   : > { %v854_v53 = vpop.f32.mrb[4].mxu0 }
 0x1f1   : > { %861 = vst.msk [vmem:[#allocation4 + $0x8] sm:$0xff] %vm473_vm1, %v854_v53  ;;  %v1763_v54 = vpop.f32.mrb[5].mxu0 }
 0x1f2   : > { %v857_v55 = vpop.f32.mrb[6].mxu0 }
 0x1f3   : > { %v1764_v56 = vpop.f32.mrb[7].mxu0 }
 0x1f4 PF: > { %v1636_v57 = vld [vmem:[%s2034_s19 + $0x8] sm:$0xff]  ;;  %v1951_v58 = vmov 0   ;;  %v1952_v59 = vmov 0.0   ;;  %vm879_vm3 = vcmask 1043456   ;;  %v1637_v60 = vld [vmem:[%s2258_s2 + $0x4] sm:$0xf]  ;;  %v866_v2 = vlaneseq }
 0x1f5   : > { %1877 = vset.pattern.permute.xlu0 %v1951_v58  ;;  %1771 = vmatprep.subr.bf16.mxu1 %v1952_v59  ;;  %v865_v61 = vld [vmem:[%s2034_s19] sm:$0xff]  ;;  %v940_v62 = vsel %vm879_vm3, %v1637_v60, 0  ;;  %vm1953_vm4 = vmmov 0   ;;  %vm875_vm6 = vcmask 64512   ;;  %vm988_vm8 = vcmask 261120   ;;  %v1881_v12 = vld [vmem:[%s2044_s25 + $0x8] sm:$0xff]  }
 0x1f6   : > { %929 = vperm.xlu0 %1877, %v1636_v57   ;;  %1765 = vmatprep.subr.bf16.mxu0 %v1952_v59  ;;  %v874_v63 = vld [vmem:[%s2258_s2] sm:$0xf]  ;;  %v2165_v3 = vand.u32 127, %v866_v2  ;;  %v1882_v13 = vld [vmem:[%s2049_s28 + $0x8] sm:$0xff]   ;;  %989 = vst.msk [vmem:[#allocation3] sm:$0xff] %vm988_vm8, %v1952_v59  ;;  %990 = vst.msk [vmem:[#allocation3 + $0x8] sm:$0xff] %vm988_vm8, %v1952_v59 }
 0x1f7   : > { %1772 = vmatpush3.bf16.msra.mxu1 %v940_v62  ;;  %1878 = vset.pattern.permute.xlu1 %v1951_v58  ;;  %v1214_v0 = vld [vmem:[%s2039_s22] sm:$0xff]  ;;  %v881_v1 = vsel %vm879_vm3, %v874_v63, 0  ;;  %vm986_vm9 = vcmask 261124   ;;  %vm924_vm10 = vcmask 257024   ;;  %v1654_v26 = vld [vmem:[%s2039_s22 + $0x8] sm:$0xff]  ;;  %v1885_v29 = vld [vmem:[%s2054_s17 + $0x10] sm:$0xff]  }
 0x1f8   : > { %1785 = vmatprep.subr.bf16.mxu1 %v1952_v59  ;;  %1218 = vperm.xlu1 %1878, %v865_v61   ;;  %v1879_v10 = vld [vmem:[%s2044_s25] sm:$0xff]   ;;  %v1884_v28 = vld [vmem:[%s2054_s17 + $0x8] sm:$0xff]   ;;  %v1886_v30 = vld [vmem:[%s2054_s17 + $0x18] sm:$0xff]   ;;  %vm1161_vm13 = vcmask 523264   ;;  %p1463_p6 = scmp.eq.s32.totalorder %s1939_s30, 3 }
 0x1f9   : > { %1773 = vmatprep.mubr.msk.bf16.mxu1 %vm1953_vm4, %v1952_v59  ;;  %1767 = vmatprep.mubr.msk.bf16.mxu0 %vm1953_vm4, %v1952_v59  ;;  %v1880_v11 = vld [vmem:[%s2049_s28] sm:$0xff]  }
 0x1fa   : > { %869 = vperm.xlu0 %1877, %v865_v61   ;;  %1766 = vmatpush3.bf16.msra.mxu0 %v881_v1  ;;  %v1883_v27 = vld [vmem:[%s2054_s17] sm:$0xff]  }
 0x1fb   : > { %1777 = vmatprep.subr.bf16.mxu0 %v1952_v59 }
 0x1fc   : > { %1343 = vperm.xlu1 %1878, %v1636_v57  }
 0x1fd   : > { %v1127_v56 = vld [vmem:[#allocation3] sm:$0xff]  ;;  %v1128_v58 = vld [vmem:[#allocation3 + $0x8] sm:$0xff] }
 0x1fe   : > { %1225 = vperm.xlu0 %1877, %v1214_v0  }
 0x200   : > { %1350 = vperm.xlu1 %1878, %v1654_v26  }
 0x275   : > { %v930_v4 = vpop.permute.xlu0 %929 }
 0x276   : > { %vm931_vm5 = vcmp.eq.s32.totalorder %v930_v4, %v2165_v3 }
 0x277   : > { %v932_v5 = vsel %vm931_vm5, 1.0, %v1952_v59  ;;  %v1219_v31 = vpop.permute.xlu1 %1218 }
 0x278   : > { %v933_v6 = vpack.c.bf16 %v932_v5, %v932_v5  ;;  %vm1220_vm11 = vcmp.eq.s32.totalorder %v1219_v31, %v2165_v3 }
 0x279   : > { %v870_v7 = vpop.permute.xlu0 %869  ;;  %v1221_v32 = vsel %vm1220_vm11, 1.0, %v1952_v59 }
 0x27a   : > { %vm871_vm7 = vcmp.eq.s32.totalorder %v870_v7, %v2165_v3  ;;  %1774 = vmatmul.mubr.msk.bf16.vlgmr.msra.gmra.mrb[0].mxu1 %vm875_vm6, %v933_v6  ;;  %1230 = vxpose.xlu0.b32.start.end [1/1] (short) (narrow) %v1221_v32, 8 }
 0x27b   : > { %v872_v8 = vsel %vm871_vm7, 1.0, %v1952_v59  ;;  %1789 = vmatprep.mubr.msk.bf16.mxu1 %vm1953_vm4, %v1952_v59  ;;  %1786 = vmatpush3.bf16.msra.mxu1 %v1880_v11  ;;  %v1344_v33 = vpop.permute.xlu1 %1343 }
 0x27c   : > { %v873_v9 = vpack.c.bf16 %v872_v8, %v872_v8  ;;  %1787 = vmatprep.subr.bf16.mxu1 %v1952_v59  ;;  %vm1345_vm12 = vcmp.eq.s32.totalorder %v1344_v33, %v2165_v3 }
 0x27d   : > { %v1346_v34 = vsel %vm1345_vm12, 1.0, %v1952_v59  ;;  %v1226_v1 = vpop.permute.xlu0 %1225 }
 0x27e   : > { %1768 = vmatmul.mubr.msk.bf16.vlgmr.msra.gmra.mrb[0].mxu0 %vm875_vm6, %v873_v9  ;;  %1356 = vxpose.xlu1.b32.start.end [1/1] (short) (narrow) %v1346_v34, 8  ;;  %v1229_v9 = vld [vmem:[#allocation4] sm:$0xff] }
 0x27f   : > { %1781 = vmatprep.mubr.msk.bf16.mxu0 %vm1953_vm4, %v1952_v59  ;;  %1778 = vmatpush3.bf16.msra.mxu0 %v1879_v10  ;;  %v1351_v3 = vpop.permute.xlu1 %1350 }
 0x280   : > { %1779 = vmatprep.subr.bf16.mxu0 %v1952_v59  ;;  %1788 = vmatpush3.bf16.msra.mxu1 %v1882_v13  ;;  %v1355_v13 = vld [vmem:[#allocation4 + $0x8] sm:$0xff] }
 0x281   : > { %1805 = vmatprep.subr.mxu1 %v1952_v59 }
 0x283   : > { %1780 = vmatpush3.bf16.msra.mxu0 %v1881_v12 }
 0x284   : > { %1793 = vmatprep.subr.bf16.mxu0 %v1952_v59 }
 0x2fa   : > { %v1246_v5 = vpop.trf.xlu0 }
 0x2fe   : > { %v1372_v8 = vpop.trf.xlu1 }
 0x34d   : > { %v976_v14 = vpop.f32.mrb[0].mxu1 }
 0x34e   : > { %v982_v15 = vpack.c.bf16 %v976_v14, %v976_v14  ;;  %v1775_v16 = vpop.f32.mrb[1].mxu1 }
 0x34f   : > { %v979_v17 = vpop.f32.mrb[2].mxu1 }
 0x350   : > { %v984_v18 = vrot.slane %v982_v15, 4  ;;  %v1776_v19 = vpop.f32.mrb[3].mxu1 }
 0x351   : > { %v917_v20 = vpop.f32.mrb[0].mxu0 }
 0x352   : > { %987 = vst.msk [vmem:[#allocation2] sm:$0xf0] %vm986_vm9, %v984_v18  ;;  %v923_v21 = vpack.c.bf16 %v917_v20, %v917_v20  ;;  %v1769_v22 = vpop.f32.mrb[1].mxu0 }
 0x353   : > { %v920_v23 = vpop.f32.mrb[2].mxu0 }
 0x354   : > { %925 = vst.msk [vmem:[#allocation2] sm:$0xf] %vm924_vm10, %v923_v21  ;;  %v1770_v24 = vpop.f32.mrb[3].mxu0 }
 0x35b   : > { %v991_v25 = vld [vmem:[#allocation2] sm:$0xff] }
 0x35c   : > { %1782 = vmatmul.mubr.msk.bf16.vlgmr.msra.gmra.mrb[4].mxu0 %vm988_vm8, %v991_v25  ;;  %1790 = vmatmul.mubr.msk.bf16.vlgmr.msra.gmra.mrb[4].mxu1 %vm988_vm8, %v991_v25 }
 0x35d   : > { %1801 = vmatprep.mubr.msk.bf16.mxu0 %vm1953_vm4, %v1952_v59  ;;  %1807 = vmatprep.mubr.msk.f32.mxu1 %vm1953_vm4, %v1952_v59 }
 0x35e   : > { %1794 = vmatpush3.bf16.msra.mxu0 %v1883_v27 }
 0x35f   : > { %1795 = vmatprep.subr.bf16.mxu0 %v1952_v59 }
 0x362   : > { %1796 = vmatpush3.bf16.msra.mxu0 %v1884_v28 }
 0x363   : > { %1797 = vmatprep.subr.bf16.mxu0 %v1952_v59 }
 0x366   : > { %1798 = vmatpush3.bf16.msra.mxu0 %v1885_v29 }
 0x367   : > { %1799 = vmatprep.subr.bf16.mxu0 %v1952_v59 }
 0x36a   : > { %1800 = vmatpush3.bf16.msra.mxu0 %v1886_v30 }
 0x42f   : > { %v1046_v35 = vpop.f32.mrb[4].mxu0  ;;  %v1103_v36 = vpop.f32.mrb[4].mxu1 }
 0x430   : > { %v1645_v37 = vmul.f32 -1.442695, %v1046_v35  ;;  %v1783_v38 = vpop.f32.mrb[5].mxu0  ;;  %v1791_v39 = vpop.f32.mrb[5].mxu1 }
 0x431   : > { %v1049_v40 = vpop.f32.mrb[6].mxu0  ;;  %v1106_v41 = vpop.f32.mrb[6].mxu1 }
 0x432   : > { %1887 = vpow2.f32 %v1645_v37  ;;  %v1646_v42 = vmul.f32 -1.442695, %v1049_v40  ;;  %v1784_v43 = vpop.f32.mrb[7].mxu0  ;;  %v1792_v44 = vpop.f32.mrb[7].mxu1 }
 0x434   : > { %1889 = vpow2.f32 %v1646_v42 }
 0x43c   : > { %v1888_v45 = vpop.eup %1887 }
 0x43d   : > { %v1116_v46 = vadd.f32 1.0, %v1888_v45 }
 0x43e   : > { %v1890_v47 = vpop.eup %1889 }
 0x43f   : > { %1891 = vrcp.f32 %v1116_v46  ;;  %v1117_v48 = vadd.f32 1.0, %v1890_v47 }
 0x441   : > { %1893 = vrcp.f32 %v1117_v48 }
 0x449   : > { %v1892_v49 = vpop.eup %1891 }
 0x44a   : > { %v1122_v50 = vmul.f32 %v1892_v49, %v1046_v35 }
 0x44b   : > { %v1894_v51 = vpop.eup %1893 }
 0x44c   : > { %v1124_v52 = vmul.f32 %v1122_v50, %v1103_v36  ;;  %v1123_v53 = vmul.f32 %v1894_v51, %v1049_v40 }
 0x44e   : > { %v1125_v54 = vmul.f32 %v1123_v53, %v1106_v41 }
 0x450   : > { %v1126_v55 = vpack.c.bf16 %v1125_v54, %v1124_v52 }
 0x452   : > { %1802 = vmatmul.mubr.msk.bf16.vlgmr.msra.gmra.mrb[8].mxu0 %vm1161_vm13, %v1126_v55 }
 0x525   : > { %v1199_v57 = vpop.f32.mrb[8].mxu0 }
 0x526   : > { %v1206_v60 = vadd.f32 %v1199_v57, %v1127_v56  ;;  %v1803_v61 = vpop.f32.mrb[9].mxu0 }
 0x527   : > { %v1202_v62 = vpop.f32.mrb[10].mxu0 }
 0x528   : > { %1208 = vst.msk [vmem:[#allocation3] sm:$0xff] %vm988_vm8, %v1206_v60  ;;  %v1207_v63 = vadd.f32 %v1202_v62, %v1128_v58  ;;  %v1804_v0 = vpop.f32.mrb[11].mxu0 }
 0x52a   : > { %1209 = vst.msk [vmem:[#allocation3 + $0x8] sm:$0xff] %vm988_vm8, %v1207_v63 }
 0x52f   : > { %v1222_v2 = vld [vmem:[#allocation3] sm:$0xff] }
 0x530   : > { %v1228_v4 = vmul.f32 %v1226_v1, %v1222_v2 }
 0x531   : > { %v1347_v6 = vld [vmem:[#allocation3 + $0x8] sm:$0xff] }
 0x532   : > { %1806 = vmatpush3.msra.mxu1 %v1228_v4  ;;  %v1353_v7 = vmul.f32 %v1351_v3, %v1347_v6 }
 0x533   : > { %1810 = vmatprep.subr.mxu1 %v1952_v59  ;;  %1808 = vmatmul.mubr.msk.f32.vlgmr.msra.gmra.mrb[8].mxu1 %vm875_vm6, %v1246_v5 }
 0x534   : > { %1811 = vmatpush3.msra.mxu1 %v1353_v7  ;;  %1812 = vmatprep.mubr.msk.f32.mxu1 %vm1953_vm4, %v1952_v59 }
 0x537   : > { %1813 = vmatmul.mubr.msk.f32.vlgmr.msra.gmra.mrb[10].mxu1 %vm875_vm6, %v1372_v8 }
 0x606   : > { %v1332_v10 = vpop.f32.mrb[8].mxu1 }
 0x607   : > { %v1336_v11 = vadd.f32 %v1332_v10, %v1229_v9  ;;  %v1809_v12 = vpop.f32.mrb[9].mxu1  ;;  %1467 = sbr.rel (!%p1463_p6) target bundleno = 1558 (0x616), region = 72 }
 0x609   : > { %1337 = vst.msk [vmem:[#allocation4] sm:$0xff] %vm988_vm8, %v1336_v11 }
 0x60a   : > { %v1457_v14 = vpop.f32.mrb[10].mxu1 }
 0x60b   : > { %v1461_v15 = vadd.f32 %v1457_v14, %v1355_v13  ;;  %v1814_v16 = vpop.f32.mrb[11].mxu1 }
 0x60d   : > { %1462 = vst.msk [vmem:[#allocation4 + $0x8] sm:$0xff] %vm988_vm8, %v1461_v15 }
 0x610   : > { %v1468_v17 = vld [vmem:[#allocation4] sm:$0xff] }
 0x611   : > { %1470 = vst.msk [vmem:[#allocation5] sm:$0xff] %vm988_vm8, %v1468_v17 }
 0x614   : > { %v1469_v18 = vld [vmem:[#allocation4 + $0x8] sm:$0xff] }
 0x615   : > { %1471 = vst.msk [vmem:[#allocation5 + $0x8] sm:$0xff] %vm988_vm8, %v1469_v18 }
 0x616 PF: > { %p2221_p7 = scmp.eq.s32.totalorder %s1595_s12, 3  ;;  %s1954_s19 = smov [#allocation5]  }
 0x617   : > { %s1478_s22 = sshll.u32 %s1954_s19, 4  ;;  %s1479_s22 = int_to_ptr.vmem [resolvable:$true] %s1478_s22 }
 0x618   : > { %s1895_s25 = scalar_lea.vmem %s1479_s22, 256  ;;  %p1902_p11 = scmp.lt.s32.totalorder %s1479_s22, %s1479_s22 }
 0x619   : > { %p1896_p8 = scmp.ne.s32.totalorder %s1479_s22, %s1895_s25  ;;  %p1903_p12 = scmp.lt.s32.totalorder %s1895_s25, %s1895_s25 }
 0x61b   : > { %p1897_p9 = pnand %p1896_p8, %p2221_p7  ;;  %p1904_p13 = por %p1903_p12, %p1902_p11 }
 0x61d   : > { %p1898_p10 = pneg %p1897_p9 }
 0x61f   : > { %p1905_p0 = pnand %p1904_p13, %p1898_p10 }
 0x621   : > { %1908 = shalt.err (!%p1905_p0)
}
 0x622   : > { %s1909_s12 = scalar_lea.hbm %s2265_s9, 256 }
 0x623   : > { %p1910_p1 = scmp.ne.s32.totalorder %s2265_s9, %s1909_s12  ;;  %p1915_p4 = scmp.lt.u32.totalorder %s1909_s12, %s2265_s9 }
 0x625   : > { %p1911_p2 = pnand %p1910_p1, %p2221_p7 }
 0x627   : > { %p1912_p3 = pneg %p1911_p2 }
 0x629   : > { %p1917_p5 = pnand %p1915_p4, %p1912_p3 }
 0x62b   : > { %1920 = shalt.err (!%p1917_p5)
}
 0x62c   : > { %s1955_s18 = smov 128   ;;  %s1956_s20 = smov 8  }
 0x62d   : > { %1816 = dma.vmem_to_hbm [thread:$0]  (%p2221_p7), %s1479_s22, 256, %s2265_s9, [#allocation6], %s1955_s18, %s1955_s18, %s1956_s20  }
 0x62e   : > { %1934 = dma.done.wait (%p2221_p7), [#allocation6], 256  }
 0x62f   : > { %1936 = vsyncadd (%p2221_p7), [#allocation6], 4294967040 }
 0x630 PF: > { %s20_s11 = sadd.s32 1, %s1947_s11   ;;  %s2267_s30 = smov %s1943_s10 }
 0x631   : > { %p17_p6 = scmp.ge.s32.totalorder %s20_s11, 6   ;;  %s2268_s10 = smov %s2270_s13 }
 0x633   :  { %19 = sbr.rel (!%p17_p6) target bundleno = 2 (0x2), region = 118 }
 0x63a   :  { %1494 = vsyncpa [#allocation6], 1 }
 0x63b   :  { %1496 = vsyncpa [#allocation6 + $0x1], 1 }

</bundles_post_ra>
